<compile_context>
chip_gen: v7x
topology: tpu7x:2x2x1
jax: 0.10.0
libtpu: 0.0.40
codegen_flags: <defaults>
</compile_context>

<pallas_src>
import functools

import jax
import jax.numpy as jnp
from jax.experimental import pallas as pl
from jax.experimental.pallas import tpu as pltpu


def _l_color_kernel(x_ref, out_ref, acc_ref, *, inv_hw, tail_rows):
    # x_ref:   (bB, 3, TH, W)   one batch block x one H tile
    # out_ref: (1, bB, 1)       per-batch k for this batch block
    # acc_ref: (bB, 3, W)       lane-shaped per-channel partial sums (f32)
    h = pl.program_id(1)
    last = pl.num_programs(1) - 1

    @pl.when(h == 0)
    def _init():
        acc_ref[...] = jnp.zeros_like(acc_ref)

    x = x_ref[...].astype(jnp.float32)                    # (bB, 3, TH, W)

    if tail_rows is None:
        # Sublane-first reduce: pure VPU adds into a lane-shaped accumulator.
        acc_ref[...] += jnp.sum(x, axis=2)                # (bB, 3, W)
    else:
        # H does not divide evenly: mask garbage rows on the last tile only.
        @pl.when(h != last)
        def _body():
            acc_ref[...] += jnp.sum(x, axis=2)

        @pl.when(h == last)
        def _tail():
            row = jax.lax.broadcasted_iota(jnp.int32, x.shape, 2)
            xm = jnp.where(row < tail_rows, x, 0.0)
            acc_ref[...] += jnp.sum(xm, axis=2)

    @pl.when(h == last)
    def _finish():
        sums = jnp.sum(acc_ref[...], axis=2)              # (bB, 3) deferred XLU reduce
        means = sums * inv_hw
        mr = means[:, 0:1]
        mg = means[:, 1:2]
        mb = means[:, 2:3]
        drg = (mr - mg) ** 2
        drb = (mr - mb) ** 2
        dgb = (mb - mg) ** 2
        k = jnp.sqrt(drg * drg + drb * drb + dgb * dgb)   # (bB, 1)
        out_ref[...] = k.reshape(out_ref.shape)


def _largest_divisor_le(n, cap):
    cap = max(1, min(n, cap))
    for d in range(cap, 0, -1):
        if n % d == 0:
            return d
    return 1


def _pick_tiles(B, H, W, itemsize, target_block_bytes, vmem_block_budget):
    """Returns (bB, TH, tail_rows) where tail_rows is None if TH divides H."""
    sub = {4: 8, 2: 16, 1: 32}.get(itemsize, 8)     # dtype-aware sublane quantum
    w_pad = ((W + 127) // 128) * 128                # lane padding in VMEM
    img_hbm = 3 * H * W * itemsize
    img_vmem = 3 * H * w_pad * itemsize

    # Case 1: whole images fit the per-block target -> tile the batch only.
    if img_hbm <= target_block_bytes and 2 * img_vmem <= vmem_block_budget:
        cap = min(target_block_bytes // img_hbm,
                  vmem_block_budget // (2 * img_vmem))
        if B >= 2:
            cap = min(cap, B // 2)   # keep nB >= 2 so both v7x TCs get work
        bB = _largest_divisor_le(B, max(1, cap))
        return bB, H, None

    # Case 2: big images -> one image per block, tile H.
    rows_hbm = target_block_bytes // (3 * W * itemsize)
    rows_vmem = vmem_block_budget // (2 * 3 * w_pad * itemsize)
    th = max(sub, (max(1, min(rows_hbm, rows_vmem)) // sub) * sub)
    if th >= H:
        return 1, H, None
    # Prefer a sublane-aligned divisor of H near the target (no masking);
    # otherwise use a cdiv grid and mask only the last H tile.
    d = th
    while d >= sub and 2 * d >= th:
        if H % d == 0:
            return 1, d, None
        d -= sub
    tail_rows = H - (pl.cdiv(H, th) - 1) * th
    return 1, th, tail_rows


def l_color_pallas(x, *, target_block_bytes=8 << 20, vmem_block_budget=24 << 20):
    B, C, H, W = x.shape
    assert C == 3, "L_color expects RGB input (C == 3)"
    itemsize = jnp.dtype(x.dtype).itemsize

    bB, TH, tail_rows = _pick_tiles(B, H, W, itemsize,
                                    target_block_bytes, vmem_block_budget)
    nB = B // bB
    nH = pl.cdiv(H, TH)
    # TODO(synk): for B == 1 on v7x, split the spatial reduction into two
    # parallel partial sums so both TensorCores stream a single huge image.

    inv_hw = 1.0 / float(H * W)
    kernel = functools.partial(_l_color_kernel, inv_hw=inv_hw, tail_rows=tail_rows)

    cost = pl.CostEstimate(
        flops=2 * B * 3 * H * W,                          # streaming adds (approx.)
        transcendentals=B,                                # one sqrt per batch element
        bytes_accessed=B * 3 * H * W * itemsize + B * 4,  # pure HBM stream + tiny out
    )

    out = pl.pallas_call(
        kernel,
        out_shape=jax.ShapeDtypeStruct((nB, bB, 1), jnp.float32),
        grid_spec=pltpu.PrefetchScalarGridSpec(
            num_scalar_prefetch=0,
            grid=(nB, nH),
            in_specs=[
                pl.BlockSpec((bB, 3, TH, W), lambda i, h: (i, 0, h, 0)),
            ],
            out_specs=pl.BlockSpec((1, bB, 1), lambda i, h: (i, 0, 0)),
            scratch_shapes=[pltpu.VMEM((bB, 3, W), jnp.float32)],
        ),
        compiler_params=pltpu.CompilerParams(
            # batch blocks are independent (megacore-parallel on v7x);
            # the H axis is the reduction axis (accumulates into scratch).
            dimension_semantics=("parallel", "arbitrary"),
            vmem_limit_bytes=48 << 20,
        ),
        cost_estimate=cost,
    )(x)
    return out.reshape(B, 1, 1, 1).astype(x.dtype)


def l_color_ref(x):
    """Plain-JAX reference matching the PyTorch forward."""
    xf = x.astype(jnp.float32)
    mean_rgb = jnp.mean(xf, axis=(2, 3), keepdims=True)   # (B, 3, 1, 1)
    mr = mean_rgb[:, 0:1]
    mg = mean_rgb[:, 1:2]
    mb = mean_rgb[:, 2:3]
    drg = (mr - mg) ** 2
    drb = (mr - mb) ** 2
    dgb = (mb - mg) ** 2
    return jnp.sqrt(drg ** 2 + drb ** 2 + dgb ** 2).astype(x.dtype)


if __name__ == "__main__":
    key = jax.random.PRNGKey(0)
    B, C, H, W = 2, 3, 16, 16
    x = jax.random.uniform(key, (B, C, H, W), dtype=jnp.float32)

    out = jax.block_until_ready(l_color_pallas(x))
    ref = jax.block_until_ready(l_color_ref(x))

    assert out.shape == (B, 1, 1, 1), out.shape
    assert jnp.allclose(out, ref, atol=1e-6, rtol=1e-5), (out, ref)
    print("KERNEL_OK")
</pallas_src>

<mosaic_0001>
module attributes {stable_mosaic.version = 11 : i64} {
  func.func @_l_color_kernel(%arg0: i32, %arg1: i32, %arg2: memref<1x3x16x16xf32, #tpu.memory_space<vmem>>, %arg3: memref<1x1x1xf32, #tpu.memory_space<vmem>>, %arg4: memref<1x3x16xf32, #tpu.memory_space<vmem>>) attributes {dimension_semantics = [#tpu.dimension_semantics<parallel>, #tpu.dimension_semantics<arbitrary>], iteration_bounds = array<i64: 2, 1>, scalar_prefetch = 0 : i64, scratch_operands = 1 : i64, tpu.core_type = #tpu.core_type<tc>, window_params = [{transform_indices = @transform_0, window_bounds = array<i64: 1, 3, 16, 16>}, {transform_indices = @transform_1, window_bounds = array<i64: 1, 1, 1>}]} {
    %c0_i32 = arith.constant 0 : i32
    %0 = arith.cmpi eq, %arg1, %c0_i32 : i32
    %1 = arith.extui %0 : i1 to i32
    %c0_i32_0 = arith.constant 0 : i32
    %2 = arith.cmpi ne, %1, %c0_i32_0 : i32
    scf.if %2 {
      %cst_12 = arith.constant 0.000000e+00 : f32
      %11 = vector.broadcast %cst_12 : f32 to vector<1x3x16xf32>
      %c0_13 = arith.constant 0 : index
      %c0_14 = arith.constant 0 : index
      %c0_15 = arith.constant 0 : index
      %12 = vector.load %arg4[%c0_13, %c0_14, %c0_15] : memref<1x3x16xf32, #tpu.memory_space<vmem>>, vector<1x3x16xf32>
      tpu.vector_store %arg4[%c0_13, %c0_14, %c0_15], %11 {strides = array<i32>} : memref<1x3x16xf32, #tpu.memory_space<vmem>>, vector<1x3x16xf32>,
    } else {
    }
    %c0 = arith.constant 0 : index
    %c0_1 = arith.constant 0 : index
    %c0_2 = arith.constant 0 : index
    %c0_3 = arith.constant 0 : index
    %3 = vector.load %arg2[%c0, %c0_1, %c0_2, %c0_3] : memref<1x3x16x16xf32, #tpu.memory_space<vmem>>, vector<1x3x16x16xf32>
    %c0_4 = arith.constant 0 : index
    %c0_5 = arith.constant 0 : index
    %c0_6 = arith.constant 0 : index
    %4 = vector.load %arg4[%c0_4, %c0_5, %c0_6] : memref<1x3x16xf32, #tpu.memory_space<vmem>>, vector<1x3x16xf32>
    %cst = arith.constant dense<0.000000e+00> : vector<1x3x16xf32>
    %5 = vector.multi_reduction <add>, %3, %cst [2] : vector<1x3x16x16xf32> to vector<1x3x16xf32>
    %6 = arith.addf %4, %5 : vector<1x3x16xf32>
    %c0_7 = arith.constant 0 : index
    %c0_8 = arith.constant 0 : index
    %c0_9 = arith.constant 0 : index
    %7 = vector.load %arg4[%c0_7, %c0_8, %c0_9] : memref<1x3x16xf32, #tpu.memory_space<vmem>>, vector<1x3x16xf32>
    tpu.vector_store %arg4[%c0_7, %c0_8, %c0_9], %6 {strides = array<i32>} : memref<1x3x16xf32, #tpu.memory_space<vmem>>, vector<1x3x16xf32>,
    %c0_i32_10 = arith.constant 0 : i32
    %8 = arith.cmpi eq, %arg1, %c0_i32_10 : i32
    %9 = arith.extui %8 : i1 to i32
    %c0_i32_11 = arith.constant 0 : i32
    %10 = arith.cmpi ne, %9, %c0_i32_11 : i32
    scf.if %10 {
      %c0_12 = arith.constant 0 : index
      %c0_13 = arith.constant 0 : index
      %c0_14 = arith.constant 0 : index
      %11 = vector.load %arg4[%c0_12, %c0_13, %c0_14] : memref<1x3x16xf32, #tpu.memory_space<vmem>>, vector<1x3x16xf32>
      %cst_15 = arith.constant dense<0.000000e+00> : vector<1x3xf32>
      %12 = vector.multi_reduction <add>, %11, %cst_15 [2] : vector<1x3x16xf32> to vector<1x3xf32>
      %cst_16 = arith.constant 3.906250e-03 : f32
      %13 = vector.broadcast %cst_16 : f32 to vector<1x3xf32>
      %14 = arith.mulf %12, %13 : vector<1x3xf32>
      %15 = vector.extract_strided_slice %14 {offsets = [0, 0], sizes = [1, 1], strides = [1, 1]} : vector<1x3xf32> to vector<1x1xf32>
      %16 = vector.extract_strided_slice %14 {offsets = [0, 1], sizes = [1, 1], strides = [1, 1]} : vector<1x3xf32> to vector<1x1xf32>
      %17 = vector.extract_strided_slice %14 {offsets = [0, 2], sizes = [1, 1], strides = [1, 1]} : vector<1x3xf32> to vector<1x1xf32>
      %18 = arith.subf %15, %16 : vector<1x1xf32>
      %19 = arith.mulf %18, %18 : vector<1x1xf32>
      %20 = arith.subf %15, %17 : vector<1x1xf32>
      %21 = arith.mulf %20, %20 : vector<1x1xf32>
      %22 = arith.subf %17, %16 : vector<1x1xf32>
      %23 = arith.mulf %22, %22 : vector<1x1xf32>
      %24 = arith.mulf %19, %19 : vector<1x1xf32>
      %25 = arith.mulf %21, %21 : vector<1x1xf32>
      %26 = arith.addf %24, %25 : vector<1x1xf32>
      %27 = arith.mulf %23, %23 : vector<1x1xf32>
      %28 = arith.addf %26, %27 : vector<1x1xf32>
      %29 = math.sqrt %28 : vector<1x1xf32>
      %30 = vector.shape_cast %29 : vector<1x1xf32> to vector<1x1x1xf32>
      %c0_17 = arith.constant 0 : index
      %c0_18 = arith.constant 0 : index
      %c0_19 = arith.constant 0 : index
      %31 = vector.load %arg3[%c0_17, %c0_18, %c0_19] : memref<1x1x1xf32, #tpu.memory_space<vmem>>, vector<1x1x1xf32>
      tpu.vector_store %arg3[%c0_17, %c0_18, %c0_19], %30 {strides = array<i32>} : memref<1x1x1xf32, #tpu.memory_space<vmem>>, vector<1x1x1xf32>,
    } else {
    }
    return
  }
  func.func @transform_0(%arg0: i32, %arg1: i32) -> (i32, i32, i32, i32) {
    %c0_i32 = arith.constant 0 : i32
    %c0_i32_0 = arith.constant 0 : i32
    %c0_i32_1 = arith.constant 0 : i32
    return %arg0, %c0_i32, %arg1, %c0_i32_0 : i32, i32, i32, i32
  }
  func.func @transform_1(%arg0: i32, %arg1: i32) -> (i32, i32, i32) {
    %c0_i32 = arith.constant 0 : i32
    %c0_i32_0 = arith.constant 0 : i32
    %c0_i32_1 = arith.constant 0 : i32
    return %arg0, %c0_i32, %c0_i32_0 : i32, i32, i32
  }
}

</mosaic_0001>

<bundles_post_ra>
// kernel: tpu_custom_call.1
= control target key start
LH: loop header
LB: loop body
LE: loop exit
PB: predicated region body
PF: predicated region fallthrough
CT: control target
= control target key end

     0   :  { %6 = vsyncpa [#allocation4], 0  ;;  %s598_s0 = inlined_call_operand.hbm [shape: f32[2,3,16,16], index: 0, kind: input, shape index: {}]   ;;  %s599_s1 = inlined_call_operand.vmem [shape: f32[2,1,1], index: 1, kind: output, shape index: {}]  }
   0x1   :  { %8 = vsyncpa [#allocation4 + $0x1], 0  ;;  %s477_s6 = smov 0   ;;  %s479_s7 = smov 0  }
   0x2   :  { %s481_s8 = smov 0   ;;  %s483_s9 = smov 0  }
   0x3   :  { %s485_s10 = smov 0   ;;  %s487_s11 = smov 0  }
   0x4 LB: > { %s310_s12 = sadd.s32 4294967295, %s461_s11   ;;  %s26_s13 = sadd.s32 1, %s457_s10  ;;  %s461_s11 = sphi %s487_s11, %s14_s11   ;;  %s457_s10 = sphi %s485_s10, %s606_s10   ;;  %s453_s9 = sphi %s483_s9, %s605_s9   ;;  %s449_s8 = sphi %s481_s8, %s604_s8   ;;  %s445_s7 = sphi %s479_s7, %s603_s7   ;;  %s441_s6 = sphi %s477_s6, %s602_s6  }
   0x5   : > { %p28_p0 = scmp.ge.s32.totalorder %s26_s13, 2  ;;  %s35_s14 = sadd.s32 1, %s449_s8 }
   0x6   : > { %p42_p1 = scmp.ne.s32.totalorder %s449_s8, %s445_s7  ;;  %p43_p2 = scmp.eq.s32.totalorder %s461_s11, 0 }
   0x7   : > { %s608_s13 = smov (%p28_p0, %s26_s13), 0  ;;  %p48_p4 = scmp.ne.s32.totalorder %s445_s7, %s441_s6 }
   0x8   : > { %p44_p3 = por %p43_p2, %p42_p1  ;;  %s30_s15 = ssub.s32 %s457_s10, %s608_s13 }
   0x9   : > { %p49_p5 = scmp.eq.s32.totalorder %s310_s12, 0  ;;  %p33_p6 = scmp.eq.s32.totalorder %s30_s15, 0 }
   0xa   : > { %p327_p8 = scmp.lt.s32.totalorder %s461_s11, 2  ;;  %s98_s18 = sand.u32 1, %s449_s8  }
   0xb   : > { %p516_p7 = por %p49_p5, %p48_p4  ;;  %s319_s19 = smul.u32 768, %s457_s10 }
   0xc   : > { %s522_s17 = scalar_select %p33_p6, %s449_s8, %s35_s14  }
   0xd   : > { %s318_s20 = smul.u32 48, %s98_s18  ;;  %s529_s23 = scalar_lea.hbm %s598_s0, %s319_s19 }
   0xe   : > { %p531_p9 = pnand %p327_p8, %p44_p3  ;;  %s537_s27 = scalar_lea.sflag [#allocation4], %s98_s18 }
   0xf   : > { %s102_s25 = scalar_lea.vmem [#allocation3], %s318_s20  ;;  %s381_s28 = scalar_lea.hbm %s529_s23, 768 }
  0x10   : > { %s111_s26 = sshll.u32 %s102_s25, 4  ;;  %p382_p10 = scmp.ne.s32.totalorder %s529_s23, %s381_s28  ;;  %s535_s26 = int_to_ptr.vmem [resolvable:$true] %s111_s26 }
  0x11   : > { %p383_p11 = pneg %p531_p9  ;;  %s386_s2 = scalar_lea.hbm %s598_s0, 1536 }
  0x12   : > { %p387_p0 = scmp.lt.u32.totalorder %s529_s23, %s598_s0  ;;  %p388_p1 = scmp.lt.u32.totalorder %s386_s2, %s381_s28 }
  0x13   : > { %p384_p12 = pnand %p383_p11, %p382_p10  ;;  %p390_p3 = scmp.lt.u32.totalorder %s381_s28, %s529_s23 }
  0x14   : > { %p389_p2 = por %p388_p1, %p387_p0 }
  0x15   : > { %p385_p13 = pneg %p384_p12 }
  0x16   : > { %p391_p4 = por %p390_p3, %p389_p2 }
  0x18   : > { %p392_p5 = pnand %p391_p4, %p385_p13 }
  0x1a   : > { %395 = shalt.err (!%p392_p5)
}
  0x1b   : > { %s396_s5 = scalar_lea.vmem %s535_s26, 768  ;;  %s463_s6 = smov [#allocation3]  }
  0x1c   : > { %p397_p6 = scmp.ne.s32.totalorder %s535_s26, %s396_s5  ;;  %s401_s12 = sshll.u32 %s463_s6, 4  ;;  %s402_s12 = int_to_ptr.vmem [resolvable:$false] %s401_s12 }
  0x1d   : > { %s403_s14 = scalar_lea.vmem %s402_s12, 1536  ;;  %p404_p12 = scmp.lt.s32.totalorder %s535_s26, %s402_s12 }
  0x1e   : > { %p399_p8 = pnand %p397_p6, %p383_p11  ;;  %p405_p0 = scmp.lt.s32.totalorder %s403_s14, %s396_s5 }
  0x20   : > { %p400_p10 = pneg %p399_p8  ;;  %p406_p1 = por %p405_p0, %p404_p12 }
  0x22   : > { %p407_p2 = pnand %p406_p1, %p400_p10 }
  0x24   : > { %410 = shalt.err (!%p407_p2)
}
  0x25   : > { %s464_s15 = smov 128   ;;  %s465_s18 = smov 8  }
  0x26   : > { %326 = dma.hbm_to_vmem [thread:$0]  (!%p531_p9), %s529_s23, 768, %s535_s26, %s537_s27, %s464_s15, %s464_s15, %s465_s18  }
  0x27   : > { %p315_p11 = scmp.ge.s32.totalorder %s461_s11, 1  ;;  %p119_p13 = scmp.lt.s32.totalorder %s461_s11, 3 }
  0x29   : > { %p120_p3 = pnand %p315_p11, %p119_p13 }
  0x2a   : > { %s125_s19 = sand.u32 (!%p120_p3), 1, %s445_s7  }
  0x2b   : > { %123 = sbr.rel (%p120_p3) target bundleno = 253 (0xfd), region = 24  ;;  %s126_s21 = scalar_lea.sflag (!%p120_p3), [#allocation4], %s125_s19 }
  0x2c   : > { %s320_s20 = smul.u32 (!%p120_p3), 48, %s125_s19 }
  0x2e   : > { %s129_s22 = scalar_lea.vmem (!%p120_p3), [#allocation3], %s320_s20 }
  0x32   : > { %436 = dma.done.wait (%p516_p7), %s126_s21, 768  }
  0x33   : > { %438 = vsyncadd (%p516_p7), %s126_s21, 4294966528  ;;  %vm154_vm0 = vcmask 124928   ;;  %v466_v0 = vmov 0.0   ;;  %vm163_vm1 = vcmask 130048   ;;  %v156_v1 = vld [vmem:[%s129_s22] sm:$0xff]  ;;  %v157_v2 = vld [vmem:[%s129_s22 + $0x8] sm:$0xff] }
  0x34   : > { %155 = vst.msk [vmem:[#allocation2] sm:$0x7] %vm154_vm0, %v466_v0  ;;  %v158_v3 = vld [vmem:[%s129_s22 + $0x10] sm:$0xff]  ;;  %v159_v4 = vld [vmem:[%s129_s22 + $0x18] sm:$0xff]  ;;  %v160_v5 = vld [vmem:[%s129_s22 + $0x20] sm:$0xff]  ;;  %v164_v7 = vsel %vm163_vm1, %v156_v1, 0.0 }
  0x35   : > { %v161_v6 = vld [vmem:[%s129_s22 + $0x28] sm:$0xff]  ;;  %v165_v8 = vsel %vm163_vm1, %v157_v2, 0.0  ;;  %v173_v9 = vsel %vm163_vm1, %v158_v3, 0.0  ;;  %v174_v11 = vsel %vm163_vm1, %v159_v4, 0.0  ;;  %v182_v12 = vsel %vm163_vm1, %v160_v5, 0.0  ;;  %p147_p7 = scmp.lt.s32.totalorder %s453_s9, 1 }
  0x36   : > { %v166_v10 = vadd.f32 %v165_v8, %v164_v7  ;;  %v183_v13 = vsel %vm163_vm1, %v161_v6, 0.0  ;;  %v175_v14 = vadd.f32 %v174_v11, %v173_v9  ;;  %vm194_vm2 = vcmask 1041409  }
  0x37   : > { %v184_v15 = vadd.f32 %v183_v13, %v182_v12  ;;  %vm196_vm3 = vcmask 1042434   ;;  %s610_s9 = smov (!%p147_p7, %s453_s9), 1  ;;  %vm238_vm5 = vcmask 0  }
  0x38   : > { %v167_v16 = vrot.slane %v166_v10, 4  ;;  %v176_v17 = vrot.slane %v175_v14, 4  ;;  %s149_s24 = scalar_lea.vmem %s599_s1, %s610_s9 }
  0x39   : > { %v185_v18 = vrot.slane %v184_v15, 4 }
  0x3a   : > { %v168_v19 = vadd.f32 %v167_v16, %v166_v10  ;;  %v177_v20 = vadd.f32 %v176_v17, %v175_v14 }
  0x3b   : > { %v186_v21 = vadd.f32 %v185_v18, %v184_v15  ;;  %v162_v34 = vld [vmem:[#allocation2] sm:$0x7] }
  0x3c   : > { %v169_v22 = vrot.slane %v168_v19, 2  ;;  %v178_v23 = vrot.slane %v177_v20, 2 }
  0x3d   : > { %v187_v24 = vrot.slane %v186_v21, 2 }
  0x3e   : > { %v170_v25 = vadd.f32 %v169_v22, %v168_v19  ;;  %v179_v26 = vadd.f32 %v178_v23, %v177_v20 }
  0x3f   : > { %v188_v27 = vadd.f32 %v187_v24, %v186_v21 }
  0x40   : > { %v171_v28 = vrot.slane %v170_v25, 1  ;;  %v180_v29 = vrot.slane %v179_v26, 1 }
  0x41   : > { %v189_v30 = vrot.slane %v188_v27, 1 }
  0x42   : > { %v172_v31 = vadd.f32 %v171_v28, %v170_v25  ;;  %v181_v32 = vadd.f32 %v180_v29, %v179_v26 }
  0x43   : > { %v190_v33 = vadd.f32 %v189_v30, %v188_v27 }
  0x44   : > { %v195_v35 = vsel %vm194_vm2, %v181_v32, %v172_v31 }
  0x45   : > { %v197_v36 = vsel %vm196_vm3, %v190_v33, %v195_v35 }
  0x46   : > { %v199_v37 = vadd.f32 %v197_v36, %v162_v34 }
  0x48   : > { %201 = vst.msk [vmem:[#allocation2] sm:$0x7] %vm154_vm0, %v199_v37 }
  0x4f   : > { %v205_v38 = vld [vmem:[#allocation2] sm:$0x7] }
  0x50   : > { %v206_v39 = vsel %vm154_vm0, %v205_v38, 0.0 }
  0x51   : > { %207 = vadd.xlane.f32.xlu0 %v206_v39 }
  0xde   : > { %v208_v40 = vpop.xlane.xlu0 %207 }
  0xdf   : > { %v209_v41 = vmul.f32 0.00390625, %v208_v40 }
  0xe1   : > { %v211_v42 = vrot.slane %v209_v41, 1  ;;  %v215_v43 = vrot.slane %v209_v41, 2  ;;  %v219_v44 = vrot.slane %v209_v41, 7 }
  0xe3   : > { %v213_v45 = vsub.f32 %v209_v41, %v211_v42  ;;  %v217_v46 = vsub.f32 %v209_v41, %v215_v43  ;;  %v221_v47 = vsub.f32 %v209_v41, %v219_v44 }
  0xe5   : > { %v214_v48 = vmul.f32 %v213_v45, %v213_v45  ;;  %v218_v49 = vmul.f32 %v217_v46, %v217_v46  ;;  %v222_v50 = vmul.f32 %v221_v47, %v221_v47 }
  0xe7   : > { %v223_v51 = vmul.f32 %v214_v48, %v214_v48  ;;  %v224_v52 = vmul.f32 %v218_v49, %v218_v49  ;;  %v226_v53 = vmul.f32 %v222_v50, %v222_v50 }
  0xe9   : > { %v225_v54 = vadd.f32 %v224_v52, %v223_v51  ;;  %v228_v55 = vrot.slane %v226_v53, 2 }
  0xeb   : > { %v230_v56 = vadd.f32 %v228_v55, %v225_v54 }
  0xed   : > { %379 = vrsqrt.f32 %v230_v56  ;;  %vm233_vm4 = vcmp.eq.f32.partialorder %v230_v56, inf  ;;  %v236_v59 = vand.u32 2147483648, %v230_v56  ;;  %vm235_vm6 = vcmp.eq.f32.partialorder %v230_v56, 0.0 }
  0xf7   : > { %v380_v57 = vpop.eup %379 }
  0xf8   : > { %v232_v58 = vmul.f32 %v380_v57, %v230_v56 }
  0xfa   : > { %v234_v60 = vsel %vm233_vm4, %v230_v56, %v232_v58 }
  0xfb   : > { %v237_v61 = vsel %vm235_vm6, %v236_v59, %v234_v60 }
  0xfc   : > { %239 = vst.msk [vmem:[%s149_s24] sm:$0x1] %vm238_vm5, %v237_v61 }
  0xfd PF: > { %s14_s11 = sadd.s32 1, %s461_s11   ;;  %s602_s6 = smov %s445_s7 }
  0xfe   : > { %p11_p9 = scmp.ge.s32.totalorder %s14_s11, 4   ;;  %s603_s7 = smov %s449_s8 }
  0xff   : > { %s604_s8 = smov %s522_s17  ;;  %s605_s9 = smov %s457_s10 }
 0x100   : > { %s606_s10 = smov %s608_s13  ;;  %13 = sbr.rel (!%p11_p9) target bundleno = 4 (0x4), region = 72 }
 0x107   :  { %257 = vsyncpa [#allocation4], 1 }
 0x108   :  { %259 = vsyncpa [#allocation4 + $0x1], 1 }

</bundles_post_ra>
